<compile_context>
chip_gen: v7x
topology: tpu7x:2x2x1
jax: 0.10.0
libtpu: 0.0.40
codegen_flags: <defaults>
</compile_context>

<pallas_src>
import functools
import math

import jax
import jax.numpy as jnp
from jax.experimental import pallas as pl
from jax.experimental.pallas import tpu as pltpu


_NEG = -1e30  # large finite negative instead of -inf (avoids -inf - -inf = NaN)


# ------------------------------------------------------------------ helpers --

def _pick_tile(dim, desired):
    """Largest tile <= desired that evenly divides dim; falls back to full dim."""
    if dim <= desired:
        return dim
    t = desired
    while t >= 8:
        if dim % t == 0:
            return t
        t //= 2
    return dim


# ------------------------------------------------------------------ kernels --

def qkv_proj_kernel(x_ref, wq_ref, wk_ref, wv_ref, bq_ref, bk_ref, bv_ref,
                    q_ref, k_ref, v_ref, accq, acck, accv):
    """Fused Q/K/V projection with folded-LoRA weights.

    Grid: (M//tm, N//tn, K//tk); K axis is the reduction (arbitrary),
    f32 accumulators live in VMEM scratch, bias added at finalize.
    """
    kk = pl.program_id(2)

    @pl.when(kk == 0)
    def _init():
        accq[...] = jnp.zeros_like(accq)
        acck[...] = jnp.zeros_like(acck)
        accv[...] = jnp.zeros_like(accv)

    x = x_ref[...]                                                   # (tm, tk)
    accq[...] += jnp.dot(x, wq_ref[...], preferred_element_type=jnp.float32)
    acck[...] += jnp.dot(x, wk_ref[...], preferred_element_type=jnp.float32)
    accv[...] += jnp.dot(x, wv_ref[...], preferred_element_type=jnp.float32)

    @pl.when(kk == pl.num_programs(2) - 1)
    def _finalize():
        q_ref[...] = (accq[...] + bq_ref[...]).astype(q_ref.dtype)
        k_ref[...] = (acck[...] + bk_ref[...]).astype(k_ref.dtype)
        v_ref[...] = (accv[...] + bv_ref[...]).astype(v_ref.dtype)


def flash_attn_kernel(q_ref, k_ref, v_ref, mask_ref, o_ref,
                      m_sc, l_sc, acc_sc, *, nh, d, tq, tk, scale):
    """Flash-style causal attention, all heads of one batch per grid step.

    Grid: (B, T//tq, T//tk); the KV axis is innermost ("arbitrary") and carries
    the online-softmax state (m, l, acc) in VMEM scratch.
    """
    qi = pl.program_id(1)
    ki = pl.program_id(2)

    @pl.when(ki == 0)
    def _init():
        m_sc[...] = jnp.full_like(m_sc, _NEG)
        l_sc[...] = jnp.zeros_like(l_sc)
        acc_sc[...] = jnp.zeros_like(acc_sc)

    # Skip KV tiles that lie strictly above the causal diagonal for this q tile.
    @pl.when(ki * tk <= qi * tq + (tq - 1))
    def _compute():
        row = qi * tq + jax.lax.broadcasted_iota(jnp.int32, (tq, tk), 0)
        col = ki * tk + jax.lax.broadcasted_iota(jnp.int32, (tq, tk), 1)
        causal = col <= row                                          # (tq, tk)
        add_mask = mask_ref[0, 0]                                    # (1, tk)

        for h in range(nh):                                          # static unroll
            lo, hi = h * d, (h + 1) * d
            qh = q_ref[0, :, lo:hi].astype(jnp.float32)              # (tq, d)
            kh = k_ref[0, :, lo:hi].astype(jnp.float32)              # (tk, d)
            vh = v_ref[0, :, lo:hi].astype(jnp.float32)              # (tk, d)

            # scores: contract over d in stored layout (no explicit k.T)
            s = jax.lax.dot_general(
                qh, kh, (((1,), (1,)), ((), ())),
                preferred_element_type=jnp.float32) * scale          # (tq, tk)
            s = jnp.where(causal, s, _NEG) + add_mask

            m_prev = m_sc[h]                                         # (tq, 1)
            m_new = jnp.maximum(m_prev, jnp.max(s, axis=-1, keepdims=True))
            alpha = jnp.exp(m_prev - m_new)                          # (tq, 1)
            p = jnp.exp(s - m_new)                                   # (tq, tk)

            l_sc[h] = alpha * l_sc[h] + jnp.sum(p, axis=-1, keepdims=True)
            acc_sc[h] = alpha * acc_sc[h] + jax.lax.dot_general(
                p, vh, (((1,), (0,)), ((), ())),
                preferred_element_type=jnp.float32)                  # (tq, d)
            m_sc[h] = m_new

    @pl.when(ki == pl.num_programs(2) - 1)
    def _finalize():
        for h in range(nh):
            lo, hi = h * d, (h + 1) * d
            # exact reciprocal for tight parity; approx=True is the perf knob
            inv_l = pl.reciprocal(l_sc[h], approx=False)             # (tq, 1)
            o_ref[0, :, lo:hi] = (acc_sc[h] * inv_l).astype(o_ref.dtype)


# ----------------------------------------------------------------- wrappers --

def fused_qkv_projection(x2d, wq_t, bq, wk_t, bk, wv_t, bv,
                         tm_desired=256, tn_desired=256, tk_desired=256):
    """x2d: (M, K); w*_t: (K, N) pre-transposed, LoRA-folded; b*: (1, N)."""
    M, K = x2d.shape
    N = wq_t.shape[1]
    tm = _pick_tile(M, tm_desired)
    tn = _pick_tile(N, tn_desired)
    tk = _pick_tile(K, tk_desired)
    grid = (M // tm, N // tn, K // tk)

    itemsize = jnp.dtype(x2d.dtype).itemsize
    cost = pl.CostEstimate(
        flops=2 * M * K * N * 3,
        transcendentals=0,
        bytes_accessed=(M * K + 3 * K * N + 3 * M * N + 3 * N) * itemsize)

    out = pl.pallas_call(
        qkv_proj_kernel,
        out_shape=tuple(jax.ShapeDtypeStruct((M, N), x2d.dtype) for _ in range(3)),
        grid_spec=pltpu.PrefetchScalarGridSpec(
            num_scalar_prefetch=0,
            grid=grid,
            in_specs=[
                pl.BlockSpec((tm, tk), lambda i, j, kk: (i, kk)),    # x
                pl.BlockSpec((tk, tn), lambda i, j, kk: (kk, j)),    # wq_t
                pl.BlockSpec((tk, tn), lambda i, j, kk: (kk, j)),    # wk_t
                pl.BlockSpec((tk, tn), lambda i, j, kk: (kk, j)),    # wv_t
                pl.BlockSpec((1, tn), lambda i, j, kk: (0, j)),      # bq
                pl.BlockSpec((1, tn), lambda i, j, kk: (0, j)),      # bk
                pl.BlockSpec((1, tn), lambda i, j, kk: (0, j)),      # bv
            ],
            out_specs=[
                pl.BlockSpec((tm, tn), lambda i, j, kk: (i, j)),
                pl.BlockSpec((tm, tn), lambda i, j, kk: (i, j)),
                pl.BlockSpec((tm, tn), lambda i, j, kk: (i, j)),
            ],
            scratch_shapes=[
                pltpu.VMEM((tm, tn), jnp.float32),
                pltpu.VMEM((tm, tn), jnp.float32),
                pltpu.VMEM((tm, tn), jnp.float32),
            ],
        ),
        compiler_params=pltpu.CompilerParams(
            dimension_semantics=("parallel", "parallel", "arbitrary")),
        cost_estimate=cost,
    )(x2d, wq_t, wk_t, wv_t, bq, bk, bv)
    return out


def flash_causal_attention(q, k, v, attn_mask, num_heads, head_size,
                           tq_desired=128, tk_desired=128):
    """q,k,v: (B, T, nh*d); attn_mask: (B, 1, 1, T) additive -> (B, T, nh*d)."""
    B, T, H = q.shape
    nh, d = num_heads, head_size
    tq = _pick_tile(T, tq_desired)
    tk = _pick_tile(T, tk_desired)
    scale = 1.0 / math.sqrt(head_size)
    grid = (B, T // tq, T // tk)

    cost = pl.CostEstimate(
        flops=4 * B * nh * T * T * d,
        transcendentals=B * nh * T * T,
        bytes_accessed=(4 * B * T * H + B * T) * 4)

    return pl.pallas_call(
        functools.partial(flash_attn_kernel, nh=nh, d=d, tq=tq, tk=tk,
                          scale=scale),
        out_shape=jax.ShapeDtypeStruct((B, T, H), q.dtype),
        grid_spec=pltpu.PrefetchScalarGridSpec(
            num_scalar_prefetch=0,
            grid=grid,
            in_specs=[
                pl.BlockSpec((1, tq, H), lambda b, qi, ki: (b, qi, 0)),    # q
                pl.BlockSpec((1, tk, H), lambda b, qi, ki: (b, ki, 0)),    # k
                pl.BlockSpec((1, tk, H), lambda b, qi, ki: (b, ki, 0)),    # v
                pl.BlockSpec((1, 1, 1, tk), lambda b, qi, ki: (b, 0, 0, ki)),
            ],
            out_specs=pl.BlockSpec((1, tq, H), lambda b, qi, ki: (b, qi, 0)),
            scratch_shapes=[
                pltpu.VMEM((nh, tq, 1), jnp.float32),   # running max m
                pltpu.VMEM((nh, tq, 1), jnp.float32),   # running sum l
                pltpu.VMEM((nh, tq, d), jnp.float32),   # running output acc
            ],
        ),
        compiler_params=pltpu.CompilerParams(
            dimension_semantics=("parallel", "parallel", "arbitrary")),
        cost_estimate=cost,
    )(q, k, v, attn_mask)


def lora_causal_self_attention(hidden_states, attention_mask, params,
                               num_heads, head_size, scaling):
    """Forward pass of LoRACausalSelfAttention (eval mode)."""
    B, T, H = hidden_states.shape
    x2d = hidden_states.reshape(B * T, H)

    def fold(p):
        # Exact fold of the eval-mode LoRA path into the frozen weight:
        #   x @ W^T + b + (x @ A^T) @ B^T * s  ==  x @ (W + s * B @ A)^T + b
        w_eff = p["W"] + scaling * (p["Blora"] @ p["A"])   # (O, H)
        return w_eff.T, p["b"].reshape(1, -1)              # (H, O) pre-transposed

    wq_t, bq = fold(params["query"])
    wk_t, bk = fold(params["key"])
    wv_t, bv = fold(params["value"])

    q2d, k2d, v2d = fused_qkv_projection(x2d, wq_t, bq, wk_t, bk, wv_t, bv)

    # Contiguous metadata reshape only -- no b t h d <-> b h t d transposes.
    q = q2d.reshape(B, T, H)
    k = k2d.reshape(B, T, H)
    v = v2d.reshape(B, T, H)

    return flash_causal_attention(q, k, v, attention_mask, num_heads, head_size)


# ---------------------------------------------------------------- reference --

def reference_forward(hidden_states, attention_mask, params,
                      num_heads, head_size, scaling):
    B, T, H = hidden_states.shape

    def lin(x, p):
        base = x @ p["W"].T + p["b"]
        lora = (x @ p["A"].T) @ p["Blora"].T * scaling
        return base + lora

    def tr(x, p):
        o = lin(x, p)
        return o.reshape(B, T, num_heads, head_size).transpose(0, 2, 1, 3)

    k = tr(hidden_states, params["key"])
    v = tr(hidden_states, params["value"])
    q = tr(hidden_states, params["query"])
    s = jnp.einsum("bhqd,bhkd->bhqk", q, k) / math.sqrt(head_size)
    causal = jnp.tril(jnp.ones((T, T)))
    s = jnp.where(causal == 0, -jnp.inf, s)
    s = s + attention_mask
    p_ = jax.nn.softmax(s, axis=-1)
    y = jnp.einsum("bhqk,bhkd->bhqd", p_, v)
    return y.transpose(0, 2, 1, 3).reshape(B, T, num_heads * head_size)


# --------------------------------------------------------------------- main --

if __name__ == "__main__":
    # Small config: hidden=32, heads=4, head_size=8, seq=8, batch=2, LoRA r=8.
    B, T, H = 2, 8, 32
    num_heads, head_size = 4, 8
    lora_r, lora_alpha = 8, 16
    scaling = lora_alpha / lora_r

    key = jax.random.PRNGKey(0)
    keys = jax.random.split(key, 16)

    def make_proj(k0, k1, k2):
        # Deterministic synthetic init (lora_B nonzero so the LoRA path matters).
        return {
            "W": 0.05 * jax.random.normal(k0, (H, H), jnp.float32),
            "b": 0.01 * jax.random.normal(k1, (H,), jnp.float32),
            "A": 0.05 * jax.random.normal(k2, (lora_r, H), jnp.float32),
            "Blora": 0.05 * jax.random.normal(
                jax.random.fold_in(k2, 7), (H, lora_r), jnp.float32),
        }

    params = {
        "query": make_proj(keys[0], keys[1], keys[2]),
        "key":   make_proj(keys[3], keys[4], keys[5]),
        "value": make_proj(keys[6], keys[7], keys[8]),
    }

    hidden_states = jax.random.normal(keys[9], (B, T, H), jnp.float32)
    attention_mask = jnp.zeros((B, 1, 1, T), jnp.float32)
    attention_mask = attention_mask.at[1, 0, 0, -2:].set(-10000.0)  # mask tail of batch 1

    out = lora_causal_self_attention(hidden_states, attention_mask, params,
                                     num_heads, head_size, scaling)
    out = jax.block_until_ready(out)

    ref = reference_forward(hidden_states, attention_mask, params,
                            num_heads, head_size, scaling)
    assert out.shape == (B, T, H)
    assert jnp.allclose(out, ref, atol=1e-4, rtol=1e-4), "mismatch vs reference"

    print("KERNEL_OK")
</pallas_src>

<mosaic_0001>
module attributes {stable_mosaic.version = 11 : i64} {
  func.func @qkv_proj_kernel(%arg0: i32, %arg1: i32, %arg2: i32, %arg3: memref<16x32xf32, #tpu.memory_space<vmem>>, %arg4: memref<32x32xf32, #tpu.memory_space<vmem>>, %arg5: memref<32x32xf32, #tpu.memory_space<vmem>>, %arg6: memref<32x32xf32, #tpu.memory_space<vmem>>, %arg7: memref<1x32xf32, #tpu.memory_space<vmem>>, %arg8: memref<1x32xf32, #tpu.memory_space<vmem>>, %arg9: memref<1x32xf32, #tpu.memory_space<vmem>>, %arg10: memref<16x32xf32, #tpu.memory_space<vmem>>, %arg11: memref<16x32xf32, #tpu.memory_space<vmem>>, %arg12: memref<16x32xf32, #tpu.memory_space<vmem>>, %arg13: memref<16x32xf32, #tpu.memory_space<vmem>>, %arg14: memref<16x32xf32, #tpu.memory_space<vmem>>, %arg15: memref<16x32xf32, #tpu.memory_space<vmem>>) attributes {dimension_semantics = [#tpu.dimension_semantics<parallel>, #tpu.dimension_semantics<parallel>, #tpu.dimension_semantics<arbitrary>], iteration_bounds = array<i64: 1, 1, 1>, scalar_prefetch = 0 : i64, scratch_operands = 3 : i64, tpu.core_type = #tpu.core_type<tc>, window_params = [{transform_indices = @transform_0, window_bounds = array<i64: 16, 32>}, {transform_indices = @transform_1, window_bounds = array<i64: 32, 32>}, {transform_indices = @transform_2, window_bounds = array<i64: 32, 32>}, {transform_indices = @transform_3, window_bounds = array<i64: 32, 32>}, {transform_indices = @transform_4, window_bounds = array<i64: 1, 32>}, {transform_indices = @transform_5, window_bounds = array<i64: 1, 32>}, {transform_indices = @transform_6, window_bounds = array<i64: 1, 32>}, {transform_indices = @transform_7, window_bounds = array<i64: 16, 32>}, {transform_indices = @transform_8, window_bounds = array<i64: 16, 32>}, {transform_indices = @transform_9, window_bounds = array<i64: 16, 32>}]} {
    %c0_i32 = arith.constant 0 : i32
    %0 = arith.cmpi eq, %arg2, %c0_i32 : i32
    %1 = arith.extui %0 : i1 to i32
    %c0_i32_0 = arith.constant 0 : i32
    %2 = arith.cmpi ne, %1, %c0_i32_0 : i32
    scf.if %2 {
      %cst_24 = arith.constant 0.000000e+00 : f32
      %22 = vector.broadcast %cst_24 : f32 to vector<16x32xf32>
      %c0_25 = arith.constant 0 : index
      %c0_26 = arith.constant 0 : index
      %23 = vector.load %arg13[%c0_25, %c0_26] : memref<16x32xf32, #tpu.memory_space<vmem>>, vector<16x32xf32>
      tpu.vector_store %arg13[%c0_25, %c0_26], %22 {strides = array<i32>} : memref<16x32xf32, #tpu.memory_space<vmem>>, vector<16x32xf32>,
      %cst_27 = arith.constant 0.000000e+00 : f32
      %24 = vector.broadcast %cst_27 : f32 to vector<16x32xf32>
      %c0_28 = arith.constant 0 : index
      %c0_29 = arith.constant 0 : index
      %25 = vector.load %arg14[%c0_28, %c0_29] : memref<16x32xf32, #tpu.memory_space<vmem>>, vector<16x32xf32>
      tpu.vector_store %arg14[%c0_28, %c0_29], %24 {strides = array<i32>} : memref<16x32xf32, #tpu.memory_space<vmem>>, vector<16x32xf32>,
      %cst_30 = arith.constant 0.000000e+00 : f32
      %26 = vector.broadcast %cst_30 : f32 to vector<16x32xf32>
      %c0_31 = arith.constant 0 : index
      %c0_32 = arith.constant 0 : index
      %27 = vector.load %arg15[%c0_31, %c0_32] : memref<16x32xf32, #tpu.memory_space<vmem>>, vector<16x32xf32>
      tpu.vector_store %arg15[%c0_31, %c0_32], %26 {strides = array<i32>} : memref<16x32xf32, #tpu.memory_space<vmem>>, vector<16x32xf32>,
    } else {
    }
    %c0 = arith.constant 0 : index
    %c0_1 = arith.constant 0 : index
    %3 = vector.load %arg3[%c0, %c0_1] : memref<16x32xf32, #tpu.memory_space<vmem>>, vector<16x32xf32>
    %c0_2 = arith.constant 0 : index
    %c0_3 = arith.constant 0 : index
    %4 = vector.load %arg13[%c0_2, %c0_3] : memref<16x32xf32, #tpu.memory_space<vmem>>, vector<16x32xf32>
    %c0_4 = arith.constant 0 : index
    %c0_5 = arith.constant 0 : index
    %5 = vector.load %arg4[%c0_4, %c0_5] : memref<32x32xf32, #tpu.memory_space<vmem>>, vector<32x32xf32>
    %cst = arith.constant dense<0.000000e+00> : vector<16x32xf32>
    %6 = tpu.matmul %3, %5, %cst {dimension_numbers = #tpu.dot_dimension_numbers<[1], [0], [0], [1], [0, 0, 1, 1], [], []>} : vector<16x32xf32>, vector<32x32xf32>, vector<16x32xf32> -> vector<16x32xf32>
    %7 = arith.addf %4, %6 : vector<16x32xf32>
    %c0_6 = arith.constant 0 : index
    %c0_7 = arith.constant 0 : index
    %8 = vector.load %arg13[%c0_6, %c0_7] : memref<16x32xf32, #tpu.memory_space<vmem>>, vector<16x32xf32>
    tpu.vector_store %arg13[%c0_6, %c0_7], %7 {strides = array<i32>} : memref<16x32xf32, #tpu.memory_space<vmem>>, vector<16x32xf32>,
    %c0_8 = arith.constant 0 : index
    %c0_9 = arith.constant 0 : index
    %9 = vector.load %arg14[%c0_8, %c0_9] : memref<16x32xf32, #tpu.memory_space<vmem>>, vector<16x32xf32>
    %c0_10 = arith.constant 0 : index
    %c0_11 = arith.constant 0 : index
    %10 = vector.load %arg5[%c0_10, %c0_11] : memref<32x32xf32, #tpu.memory_space<vmem>>, vector<32x32xf32>
    %cst_12 = arith.constant dense<0.000000e+00> : vector<16x32xf32>
    %11 = tpu.matmul %3, %10, %cst_12 {dimension_numbers = #tpu.dot_dimension_numbers<[1], [0], [0], [1], [0, 0, 1, 1], [], []>} : vector<16x32xf32>, vector<32x32xf32>, vector<16x32xf32> -> vector<16x32xf32>
    %12 = arith.addf %9, %11 : vector<16x32xf32>
    %c0_13 = arith.constant 0 : index
    %c0_14 = arith.constant 0 : index
    %13 = vector.load %arg14[%c0_13, %c0_14] : memref<16x32xf32, #tpu.memory_space<vmem>>, vector<16x32xf32>
    tpu.vector_store %arg14[%c0_13, %c0_14], %12 {strides = array<i32>} : memref<16x32xf32, #tpu.memory_space<vmem>>, vector<16x32xf32>,
    %c0_15 = arith.constant 0 : index
    %c0_16 = arith.constant 0 : index
    %14 = vector.load %arg15[%c0_15, %c0_16] : memref<16x32xf32, #tpu.memory_space<vmem>>, vector<16x32xf32>
    %c0_17 = arith.constant 0 : index
    %c0_18 = arith.constant 0 : index
    %15 = vector.load %arg6[%c0_17, %c0_18] : memref<32x32xf32, #tpu.memory_space<vmem>>, vector<32x32xf32>
    %cst_19 = arith.constant dense<0.000000e+00> : vector<16x32xf32>
    %16 = tpu.matmul %3, %15, %cst_19 {dimension_numbers = #tpu.dot_dimension_numbers<[1], [0], [0], [1], [0, 0, 1, 1], [], []>} : vector<16x32xf32>, vector<32x32xf32>, vector<16x32xf32> -> vector<16x32xf32>
    %17 = arith.addf %14, %16 : vector<16x32xf32>
    %c0_20 = arith.constant 0 : index
    %c0_21 = arith.constant 0 : index
    %18 = vector.load %arg15[%c0_20, %c0_21] : memref<16x32xf32, #tpu.memory_space<vmem>>, vector<16x32xf32>
    tpu.vector_store %arg15[%c0_20, %c0_21], %17 {strides = array<i32>} : memref<16x32xf32, #tpu.memory_space<vmem>>, vector<16x32xf32>,
    %c0_i32_22 = arith.constant 0 : i32
    %19 = arith.cmpi eq, %arg2, %c0_i32_22 : i32
    %20 = arith.extui %19 : i1 to i32
    %c0_i32_23 = arith.constant 0 : i32
    %21 = arith.cmpi ne, %20, %c0_i32_23 : i32
    scf.if %21 {
      %c0_24 = arith.constant 0 : index
      %c0_25 = arith.constant 0 : index
      %22 = vector.load %arg13[%c0_24, %c0_25] : memref<16x32xf32, #tpu.memory_space<vmem>>, vector<16x32xf32>
      %c0_26 = arith.constant 0 : index
      %c0_27 = arith.constant 0 : index
      %23 = vector.load %arg7[%c0_26, %c0_27] : memref<1x32xf32, #tpu.memory_space<vmem>>, vector<1x32xf32>
      %24 = vector.broadcast %23 : vector<1x32xf32> to vector<16x32xf32>
      %25 = arith.addf %22, %24 : vector<16x32xf32>
      %c0_28 = arith.constant 0 : index
      %c0_29 = arith.constant 0 : index
      %26 = vector.load %arg10[%c0_28, %c0_29] : memref<16x32xf32, #tpu.memory_space<vmem>>, vector<16x32xf32>
      tpu.vector_store %arg10[%c0_28, %c0_29], %25 {strides = array<i32>} : memref<16x32xf32, #tpu.memory_space<vmem>>, vector<16x32xf32>,
      %c0_30 = arith.constant 0 : index
      %c0_31 = arith.constant 0 : index
      %27 = vector.load %arg14[%c0_30, %c0_31] : memref<16x32xf32, #tpu.memory_space<vmem>>, vector<16x32xf32>
      %c0_32 = arith.constant 0 : index
      %c0_33 = arith.constant 0 : index
      %28 = vector.load %arg8[%c0_32, %c0_33] : memref<1x32xf32, #tpu.memory_space<vmem>>, vector<1x32xf32>
      %29 = vector.broadcast %28 : vector<1x32xf32> to vector<16x32xf32>
      %30 = arith.addf %27, %29 : vector<16x32xf32>
      %c0_34 = arith.constant 0 : index
      %c0_35 = arith.constant 0 : index
      %31 = vector.load %arg11[%c0_34, %c0_35] : memref<16x32xf32, #tpu.memory_space<vmem>>, vector<16x32xf32>
      tpu.vector_store %arg11[%c0_34, %c0_35], %30 {strides = array<i32>} : memref<16x32xf32, #tpu.memory_space<vmem>>, vector<16x32xf32>,
      %c0_36 = arith.constant 0 : index
      %c0_37 = arith.constant 0 : index
      %32 = vector.load %arg15[%c0_36, %c0_37] : memref<16x32xf32, #tpu.memory_space<vmem>>, vector<16x32xf32>
      %c0_38 = arith.constant 0 : index
      %c0_39 = arith.constant 0 : index
      %33 = vector.load %arg9[%c0_38, %c0_39] : memref<1x32xf32, #tpu.memory_space<vmem>>, vector<1x32xf32>
      %34 = vector.broadcast %33 : vector<1x32xf32> to vector<16x32xf32>
      %35 = arith.addf %32, %34 : vector<16x32xf32>
      %c0_40 = arith.constant 0 : index
      %c0_41 = arith.constant 0 : index
      %36 = vector.load %arg12[%c0_40, %c0_41] : memref<16x32xf32, #tpu.memory_space<vmem>>, vector<16x32xf32>
      tpu.vector_store %arg12[%c0_40, %c0_41], %35 {strides = array<i32>} : memref<16x32xf32, #tpu.memory_space<vmem>>, vector<16x32xf32>,
    } else {
    }
    return
  }
  func.func @transform_0(%arg0: i32, %arg1: i32, %arg2: i32) -> (i32, i32) {
    %c0_i32 = arith.constant 0 : i32
    return %arg0, %arg2 : i32, i32
  }
  func.func @transform_1(%arg0: i32, %arg1: i32, %arg2: i32) -> (i32, i32) {
    %c0_i32 = arith.constant 0 : i32
    return %arg2, %arg1 : i32, i32
  }
  func.func @transform_2(%arg0: i32, %arg1: i32, %arg2: i32) -> (i32, i32) {
    %c0_i32 = arith.constant 0 : i32
    return %arg2, %arg1 : i32, i32
  }
  func.func @transform_3(%arg0: i32, %arg1: i32, %arg2: i32) -> (i32, i32) {
    %c0_i32 = arith.constant 0 : i32
    return %arg2, %arg1 : i32, i32
  }
  func.func @transform_4(%arg0: i32, %arg1: i32, %arg2: i32) -> (i32, i32) {
    %c0_i32 = arith.constant 0 : i32
    %c0_i32_0 = arith.constant 0 : i32
    return %c0_i32, %arg1 : i32, i32
  }
  func.func @transform_5(%arg0: i32, %arg1: i32, %arg2: i32) -> (i32, i32) {
    %c0_i32 = arith.constant 0 : i32
    %c0_i32_0 = arith.constant 0 : i32
    return %c0_i32, %arg1 : i32, i32
  }
  func.func @transform_6(%arg0: i32, %arg1: i32, %arg2: i32) -> (i32, i32) {
    %c0_i32 = arith.constant 0 : i32
    %c0_i32_0 = arith.constant 0 : i32
    return %c0_i32, %arg1 : i32, i32
  }
  func.func @transform_7(%arg0: i32, %arg1: i32, %arg2: i32) -> (i32, i32) {
    %c0_i32 = arith.constant 0 : i32
    return %arg0, %arg1 : i32, i32
  }
  func.func @transform_8(%arg0: i32, %arg1: i32, %arg2: i32) -> (i32, i32) {
    %c0_i32 = arith.constant 0 : i32
    return %arg0, %arg1 : i32, i32
  }
  func.func @transform_9(%arg0: i32, %arg1: i32, %arg2: i32) -> (i32, i32) {
    %c0_i32 = arith.constant 0 : i32
    return %arg0, %arg1 : i32, i32
  }
}

</mosaic_0001>

<bundles_post_ra>
// kernel: tpu_custom_call.1
= control target key start
LH: loop header
LB: loop body
LE: loop exit
PB: predicated region body
PF: predicated region fallthrough
CT: control target
= control target key end

     0   :  { %15 = vsyncpa [#allocation6], 0  ;;  %s930_s0 = inlined_call_operand.hbm [shape: f32[16,32], index: 0, kind: input, shape index: {}]   ;;  %s931_s1 = inlined_call_operand.hbm [shape: f32[32,32], index: 1, kind: input, shape index: {}]   ;;  %s932_s2 = inlined_call_operand.hbm [shape: f32[32,32], index: 2, kind: input, shape index: {}]   ;;  %s933_s3 = inlined_call_operand.hbm [shape: f32[32,32], index: 3, kind: input, shape index: {}]   ;;  %s934_s4 = inlined_call_operand.vmem [shape: f32[1,32], index: 4, kind: input, shape index: {}]   ;;  %s935_s5 = inlined_call_operand.vmem [shape: f32[1,32], index: 5, kind: input, shape index: {}]   ;;  %s936_s6 = inlined_call_operand.vmem [shape: f32[1,32], index: 6, kind: input, shape index: {}]   ;;  %s937_s7 = inlined_call_operand.hbm [shape: f32[16,32], index: 7, kind: output, shape index: {0}]   ;;  %s938_s8 = inlined_call_operand.hbm [shape: f32[16,32], index: 8, kind: output, shape index: {1}]   ;;  %s939_s9 = inlined_call_operand.hbm [shape: f32[16,32], index: 9, kind: output, shape index: {2}]  }
   0x1   :  { %16 = vsyncpa [#allocation9], 0 }
   0x2   :  { %17 = vsyncpa [#allocation12], 0 }
   0x3   :  { %18 = vsyncpa [#allocation7], 0 }
   0x4   :  { %19 = vsyncpa [#allocation15], 0  ;;  %s711_s30 = smov [#allocation8]   ;;  %s712_s11 = smov [#allocation5]  }
   0x5   :  { %s37_s10 = sshll.u32 %s711_s30, 4  ;;  %s25_s12 = sshll.u32 %s712_s11, 4  ;;  %s38_s10 = int_to_ptr.vmem [resolvable:$true] %s37_s10  ;;  %s771_s12 = int_to_ptr.vmem [resolvable:$true] %s25_s12 }
   0x6   :  { %s547_s15 = scalar_lea.hbm %s931_s1, 512 }
   0x7   :  { %p548_p0 = scmp.ne.s32.totalorder %s931_s1, %s547_s15  ;;  %p551_p1 = scmp.lt.u32.totalorder %s547_s15, %s931_s1 }
   0x9   :  { %p553_p2 = pnand %p551_p1, %p548_p0 }
   0xb   :  { %556 = shalt.err (!%p553_p2)
}
   0xc   :  { %s557_s20 = scalar_lea.vmem %s38_s10, 512  ;;  %p562_p4 = scmp.lt.s32.totalorder %s38_s10, %s38_s10 }
   0xd   :  { %p558_p3 = scmp.ne.s32.totalorder %s38_s10, %s557_s20  ;;  %p563_p5 = scmp.lt.s32.totalorder %s557_s20, %s557_s20 }
   0xf   :  { %p564_p6 = por %p563_p5, %p562_p4 }
  0x11   :  { %p565_p7 = pnand %p564_p6, %p558_p3 }
  0x13   :  { %568 = shalt.err (!%p565_p7)
}
  0x14   :  { %s713_s21 = smov 128   ;;  %s714_s22 = smov 8  }
  0x15   :  { %43 = dma.hbm_to_vmem [thread:$0]  %s931_s1, 512, %s38_s10, [#allocation9], %s713_s21, %s713_s21, %s714_s22  }
  0x16   :  { %s569_s27 = scalar_lea.hbm %s930_s0, 256 }
  0x17   :  { %p570_p8 = scmp.ne.s32.totalorder %s930_s0, %s569_s27  ;;  %p573_p9 = scmp.lt.u32.totalorder %s569_s27, %s930_s0 }
  0x19   :  { %p575_p10 = pnand %p573_p9, %p570_p8 }
  0x1b   :  { %578 = shalt.err (!%p575_p10)
}
  0x1c   :  { %s579_s13 = scalar_lea.vmem %s771_s12, 256  ;;  %p584_p12 = scmp.lt.s32.totalorder %s771_s12, %s771_s12 }
  0x1d   :  { %p580_p11 = scmp.ne.s32.totalorder %s771_s12, %s579_s13  ;;  %p585_p13 = scmp.lt.s32.totalorder %s579_s13, %s579_s13 }
  0x1f   :  { %p586_p0 = por %p585_p13, %p584_p12 }
  0x21   :  { %p587_p1 = pnand %p586_p0, %p580_p11 }
  0x23   :  { %590 = shalt.err (!%p587_p1)
}
  0x24   :  { %31 = dma.hbm_to_vmem [thread:$0]  %s930_s0, 256, %s771_s12, [#allocation6], %s713_s21, %s713_s21, %s714_s22  }
  0x25   :  { %s715_s14 = smov [#allocation10]   ;;  %s716_s16 = smov [#allocation11]  }
  0x26   :  { %s49_s15 = sshll.u32 %s715_s14, 4  ;;  %s61_s17 = sshll.u32 %s716_s16, 4  ;;  %s50_s15 = int_to_ptr.vmem [resolvable:$true] %s49_s15  ;;  %s808_s17 = int_to_ptr.vmem [resolvable:$true] %s61_s17 }
  0x27   :  { %s591_s20 = scalar_lea.hbm %s932_s2, 512 }
  0x28   :  { %p592_p2 = scmp.ne.s32.totalorder %s932_s2, %s591_s20  ;;  %p595_p3 = scmp.lt.u32.totalorder %s591_s20, %s932_s2 }
  0x2a   :  { %p597_p4 = pnand %p595_p3, %p592_p2 }
  0x2c   :  { %600 = shalt.err (!%p597_p4)
}
  0x2d   :  { %s601_s0 = scalar_lea.vmem %s50_s15, 512  ;;  %p606_p6 = scmp.lt.s32.totalorder %s50_s15, %s50_s15 }
  0x2e   :  { %p602_p5 = scmp.ne.s32.totalorder %s50_s15, %s601_s0  ;;  %p607_p7 = scmp.lt.s32.totalorder %s601_s0, %s601_s0 }
  0x30   :  { %p608_p8 = por %p607_p7, %p606_p6 }
  0x32   :  { %p609_p9 = pnand %p608_p8, %p602_p5 }
  0x34   :  { %612 = shalt.err (!%p609_p9)
}
  0x35   :  { %55 = dma.hbm_to_vmem [thread:$0]  %s932_s2, 512, %s50_s15, [#allocation9], %s713_s21, %s713_s21, %s714_s22  }
  0x36   :  { %s613_s30 = scalar_lea.hbm %s933_s3, 512 }
  0x37   :  { %p614_p10 = scmp.ne.s32.totalorder %s933_s3, %s613_s30  ;;  %p617_p11 = scmp.lt.u32.totalorder %s613_s30, %s933_s3 }
  0x39   :  { %p619_p12 = pnand %p617_p11, %p614_p10 }
  0x3b   :  { %622 = shalt.err (!%p619_p12)
}
  0x3c   :  { %s623_s14 = scalar_lea.vmem %s808_s17, 512  ;;  %p628_p0 = scmp.lt.s32.totalorder %s808_s17, %s808_s17 }
  0x3d   :  { %p624_p13 = scmp.ne.s32.totalorder %s808_s17, %s623_s14  ;;  %p629_p1 = scmp.lt.s32.totalorder %s623_s14, %s623_s14 }
  0x3f   :  { %p630_p2 = por %p629_p1, %p628_p0 }
  0x41   :  { %p631_p3 = pnand %p630_p2, %p624_p13 }
  0x43   :  { %634 = shalt.err (!%p631_p3)
}
  0x44   :  { %67 = dma.hbm_to_vmem [thread:$0]  %s933_s3, 512, %s808_s17, [#allocation12], %s713_s21, %s713_s21, %s714_s22  }
  0x45   :  { %701 = dma.done.wait [#allocation6], 256  }
  0x46   :  { %702 = vsyncadd [#allocation6], 4294967040 }
  0x47   :  { %703 = dma.done.wait [#allocation9], 1024  }
  0x48   :  { %704 = vsyncadd [#allocation9], 4294966272 }
  0x49   :  { %705 = dma.done.wait [#allocation12], 512  }
  0x4a   :  { %706 = vsyncadd [#allocation12], 4294966784  ;;  %vm90_vm0 = vcmask 261120   ;;  %v717_v0 = vmov 0.0   ;;  %v101_v1 = vld [vmem:[#allocation8] sm:$0xff]  ;;  %v102_v2 = vld [vmem:[#allocation8 + $0x8] sm:$0xff] }
  0x4b   :  { %92 = vst.msk [vmem:[#allocation2 + $0x8] sm:$0xff] %vm90_vm0, %v717_v0  ;;  %91 = vst.msk [vmem:[#allocation2] sm:$0xff] %vm90_vm0, %v717_v0  ;;  %v103_v3 = vld [vmem:[#allocation8 + $0x10] sm:$0xff]  ;;  %v513_v4 = vpack.c.bf16 %v102_v2, %v101_v1  ;;  %v104_v5 = vld [vmem:[#allocation8 + $0x18] sm:$0xff]  ;;  %s718_s19 = smov [#allocation13]   ;;  %s719_s23 = smov [#allocation14]  }
  0x4c   :  { %93 = vst.msk [vmem:[#allocation3] sm:$0xff] %vm90_vm0, %v717_v0  ;;  %94 = vst.msk [vmem:[#allocation3 + $0x8] sm:$0xff] %vm90_vm0, %v717_v0  ;;  %v193_v6 = vld [vmem:[#allocation10] sm:$0xff]  ;;  %v194_v7 = vld [vmem:[#allocation10 + $0x8] sm:$0xff]  ;;  %v517_v8 = vpack.c.bf16 %v104_v5, %v103_v3  ;;  %s408_s20 = sshll.u32 %s718_s19, 4  ;;  %s420_s24 = sshll.u32 %s719_s23, 4  ;;  %s409_s20 = int_to_ptr.vmem [resolvable:$true] %s408_s20  ;;  %s869_s24 = int_to_ptr.vmem [resolvable:$true] %s420_s24 }
  0x4d   :  { %95 = vst.msk [vmem:[#allocation4] sm:$0xff] %vm90_vm0, %v717_v0  ;;  %96 = vst.msk [vmem:[#allocation4 + $0x8] sm:$0xff] %vm90_vm0, %v717_v0  ;;  %v521_v9 = vpack.c.bf16 %v194_v7, %v193_v6  ;;  %v97_v10 = vld [vmem:[#allocation5] sm:$0xff]  ;;  %v278_v11 = vld [vmem:[#allocation11] sm:$0xff]  ;;  %514 = vmatprep.subr.bf16.mxu0 %v513_v4  ;;  %s635_s25 = scalar_lea.vmem %s409_s20, 256  ;;  %p640_p5 = scmp.lt.s32.totalorder %s409_s20, %s409_s20 }
  0x4e   :  { %488 = vmatprep.mubr.msk.f32.mxu0 %vm90_vm0, %v97_v10  ;;  %v279_v12 = vld [vmem:[#allocation11 + $0x8] sm:$0xff]  ;;  %v195_v13 = vld [vmem:[#allocation10 + $0x10] sm:$0xff]  ;;  %v196_v14 = vld [vmem:[#allocation10 + $0x18] sm:$0xff]  ;;  %516 = vmatpush3.bf16.msra.mxu0 %v513_v4  ;;  %p636_p4 = scmp.ne.s32.totalorder %s409_s20, %s635_s25  ;;  %p641_p6 = scmp.lt.s32.totalorder %s635_s25, %s635_s25 }
  0x4f   :  { %522 = vmatprep.subr.bf16.mxu1 %v521_v9  ;;  %v525_v15 = vpack.c.bf16 %v196_v14, %v195_v13  ;;  %518 = vmatprep.subr.bf16.mxu0 %v517_v8  ;;  %v529_v16 = vpack.c.bf16 %v279_v12, %v278_v11  ;;  %v280_v17 = vld [vmem:[#allocation11 + $0x10] sm:$0xff]  ;;  %v281_v18 = vld [vmem:[#allocation11 + $0x18] sm:$0xff]  ;;  %v459_v36 = vld [vmem:[%s934_s4] ss:$0 sm:$0xff] }
  0x50   :  { %524 = vmatpush3.bf16.msra.mxu1 %v521_v9  ;;  %499 = vmatprep.mubr.msk.f32.mxu1 %vm90_vm0, %v97_v10  ;;  %v98_v19 = vld [vmem:[#allocation5 + $0x8] sm:$0xff]  ;;  %v533_v20 = vpack.c.bf16 %v281_v18, %v280_v17  ;;  %v460_v39 = vld [vmem:[%s935_s5] ss:$0 sm:$0xff]  ;;  %p642_p7 = por %p641_p6, %p640_p5 }
  0x51   :  { %526 = vmatprep.subr.bf16.mxu1 %v525_v15  ;;  %v461_v49 = vld [vmem:[%s936_s6] ss:$0 sm:$0xff] }
  0x52   :  { %520 = vmatpush3.bf16.msra.mxu0 %v517_v8  ;;  %v100_v21 = vld [vmem:[#allocation2 + $0x8] sm:$0xff]  ;;  %v99_v22 = vld [vmem:[#allocation2] sm:$0xff]  ;;  %p643_p8 = pnand %p642_p7, %p636_p4 }
  0x53   :  { %530 = vmatprep.subr.bf16.mxu0 %v529_v16  ;;  %v192_v23 = vld [vmem:[#allocation3 + $0x8] sm:$0xff]  ;;  %v191_v25 = vld [vmem:[#allocation3] sm:$0xff] }
  0x54   :  { %528 = vmatpush3.bf16.msra.mxu1 %v525_v15  ;;  %v277_v33 = vld [vmem:[#allocation4 + $0x8] sm:$0xff]  ;;  %v276_v34 = vld [vmem:[#allocation4] sm:$0xff] }
  0x55   :  { %489 = vmatmul.mubr.msk.f32.vlgmr.msra.gmra.mrb[0].mxu0 %vm90_vm0, %v98_v19 }
  0x56   :  { %532 = vmatpush3.bf16.msra.mxu0 %v529_v16  ;;  %510 = vmatprep.mubr.msk.f32.mxu0 %vm90_vm0, %v97_v10 }
  0x57   :  { %500 = vmatmul.mubr.msk.f32.vlgmr.msra.gmra.mrb[0].mxu1 %vm90_vm0, %v98_v19  ;;  %534 = vmatprep.subr.bf16.mxu0 %v533_v20 }
  0x5a   :  { %536 = vmatpush3.bf16.msra.mxu0 %v533_v20 }
  0x5d   :  { %511 = vmatmul.mubr.msk.f32.vlgmr.msra.gmra.mrb[2].mxu0 %vm90_vm0, %v98_v19 }
 0x128   :  { %v490_v24 = vpop.f32.mrb[0].mxu0 }
 0x129   :  { %v188_v26 = vadd.f32 %v490_v24, %v100_v21  ;;  %v178_v27 = vpop.f32.mrb[1].mxu0 }
 0x12a   :  { %v501_v28 = vpop.f32.mrb[0].mxu1  ;;  %v187_v29 = vadd.f32 %v178_v27, %v99_v22 }
 0x12b   :  { %v273_v30 = vadd.f32 %v501_v28, %v192_v23  ;;  %v263_v31 = vpop.f32.mrb[1].mxu1  ;;  %190 = vst.msk [vmem:[#allocation2 + $0x8] sm:$0xff] %vm90_vm0, %v188_v26 }
 0x12c   :  { %v272_v32 = vadd.f32 %v263_v31, %v191_v25  ;;  %189 = vst.msk [vmem:[#allocation2] sm:$0xff] %vm90_vm0, %v187_v29 }
 0x12d   :  { %275 = vst.msk [vmem:[#allocation3 + $0x8] sm:$0xff] %vm90_vm0, %v273_v30 }
 0x12e   :  { %274 = vst.msk [vmem:[#allocation3] sm:$0xff] %vm90_vm0, %v272_v32 }
 0x130   :  { %v512_v35 = vpop.f32.mrb[2].mxu0 }
 0x131   :  { %v358_v37 = vadd.f32 %v512_v35, %v277_v33  ;;  %v348_v38 = vpop.f32.mrb[3].mxu0 }
 0x132   :  { %v357_v40 = vadd.f32 %v348_v38, %v276_v34  ;;  %v365_v41 = vld [vmem:[#allocation2 + $0x8] sm:$0xff] }
 0x133   :  { %360 = vst.msk [vmem:[#allocation4 + $0x8] sm:$0xff] %vm90_vm0, %v358_v37  ;;  %v364_v43 = vld [vmem:[#allocation2] sm:$0xff]  ;;  %v374_v44 = vadd.f32 %v459_v36, %v365_v41 }
 0x134   :  { %v378_v42 = vld [vmem:[#allocation3 + $0x8] sm:$0xff]  ;;  %359 = vst.msk [vmem:[#allocation4] sm:$0xff] %vm90_vm0, %v357_v40  ;;  %v373_v47 = vadd.f32 %v459_v36, %v364_v43 }
 0x135   :  { %v377_v45 = vld [vmem:[#allocation3] sm:$0xff]  ;;  %v387_v46 = vadd.f32 %v460_v39, %v378_v42  ;;  %376 = vst.msk [vmem:[#allocation13 + $0x8] sm:$0xff] %vm90_vm0, %v374_v44 }
 0x136   :  { %v386_v48 = vadd.f32 %v460_v39, %v377_v45  ;;  %375 = vst.msk [vmem:[#allocation13] sm:$0xff] %vm90_vm0, %v373_v47 }
 0x137   :  { %389 = vst.msk [vmem:[#allocation14 + $0x8] sm:$0xff] %vm90_vm0, %v387_v46 }
 0x138   :  { %388 = vst.msk [vmem:[#allocation14] sm:$0xff] %vm90_vm0, %v386_v48 }
 0x139   :  { %646 = shalt.err (!%p643_p8)
}
 0x13a   :  { %s647_s12 = scalar_lea.hbm %s937_s7, 256 }
 0x13b   :  { %p648_p9 = scmp.ne.s32.totalorder %s937_s7, %s647_s12  ;;  %p651_p10 = scmp.lt.u32.totalorder %s647_s12, %s937_s7 }
 0x13d   :  { %p653_p11 = pnand %p651_p10, %p648_p9 }
 0x13f   :  { %656 = shalt.err (!%p653_p11)
}
 0x140   :  { %414 = dma.vmem_to_hbm [thread:$0]  %s409_s20, 256, %s937_s7, [#allocation7], %s713_s21, %s713_s21, %s714_s22  }
 0x141   :  { %s657_s13 = scalar_lea.vmem %s869_s24, 256  ;;  %p662_p13 = scmp.lt.s32.totalorder %s869_s24, %s869_s24 }
 0x142   :  { %p658_p12 = scmp.ne.s32.totalorder %s869_s24, %s657_s13  ;;  %p663_p0 = scmp.lt.s32.totalorder %s657_s13, %s657_s13 }
 0x144   :  { %p664_p1 = por %p663_p0, %p662_p13 }
 0x146   :  { %p665_p2 = pnand %p664_p1, %p658_p12 }
 0x148   :  { %668 = shalt.err (!%p665_p2)
}
 0x149   :  { %s669_s14 = scalar_lea.hbm %s938_s8, 256 }
 0x14a   :  { %p670_p3 = scmp.ne.s32.totalorder %s938_s8, %s669_s14  ;;  %p673_p4 = scmp.lt.u32.totalorder %s669_s14, %s938_s8 }
 0x14c   :  { %p675_p5 = pnand %p673_p4, %p670_p3 }
 0x14e   :  { %678 = shalt.err (!%p675_p5)
}
 0x14f   :  { %426 = dma.vmem_to_hbm [thread:$0]  %s869_s24, 256, %s938_s8, [#allocation15], %s713_s21, %s713_s21, %s714_s22   ;;  %v391_v50 = vld [vmem:[#allocation4 + $0x8] sm:$0xff]  ;;  %v390_v51 = vld [vmem:[#allocation4] sm:$0xff] }
 0x150   :  { %s720_s18 = smov [#allocation16]   ;;  %v400_v52 = vadd.f32 %v461_v49, %v391_v50  ;;  %v399_v53 = vadd.f32 %v461_v49, %v390_v51 }
 0x151   :  { %s432_s19 = sshll.u32 %s720_s18, 4  ;;  %s433_s19 = int_to_ptr.vmem [resolvable:$true] %s432_s19 }
 0x152   :  { %402 = vst.msk [vmem:[#allocation16 + $0x8] sm:$0xff] %vm90_vm0, %v400_v52  ;;  %401 = vst.msk [vmem:[#allocation16] sm:$0xff] %vm90_vm0, %v399_v53  ;;  %s679_s20 = scalar_lea.vmem %s433_s19, 256  ;;  %p684_p7 = scmp.lt.s32.totalorder %s433_s19, %s433_s19 }
 0x153   :  { %p680_p6 = scmp.ne.s32.totalorder %s433_s19, %s679_s20  ;;  %p685_p8 = scmp.lt.s32.totalorder %s679_s20, %s679_s20 }
 0x155   :  { %p686_p9 = por %p685_p8, %p684_p7 }
 0x157   :  { %p687_p10 = pnand %p686_p9, %p680_p6 }
 0x159   :  { %690 = shalt.err (!%p687_p10)
}
 0x15a   :  { %s691_s24 = scalar_lea.hbm %s939_s9, 256 }
 0x15b   :  { %p692_p11 = scmp.ne.s32.totalorder %s939_s9, %s691_s24  ;;  %p695_p12 = scmp.lt.u32.totalorder %s691_s24, %s939_s9 }
 0x15d   :  { %p697_p13 = pnand %p695_p12, %p692_p11 }
 0x15f   :  { %700 = shalt.err (!%p697_p13)
}
 0x160   :  { %438 = dma.vmem_to_hbm [thread:$0]  %s433_s19, 256, %s939_s9, [#allocation15], %s713_s21, %s713_s21, %s714_s22  }
 0x161   :  { %707 = dma.done.wait [#allocation7], 256  }
 0x162   :  { %708 = vsyncadd [#allocation7], 4294967040 }
 0x163   :  { %709 = dma.done.wait [#allocation15], 512  }
 0x164   :  { %710 = vsyncadd [#allocation15], 4294966784 }
 0x165   :  { %448 = vsyncpa [#allocation6], 1 }
 0x166   :  { %449 = vsyncpa [#allocation9], 1 }
 0x167   :  { %450 = vsyncpa [#allocation12], 1 }
 0x168   :  { %451 = vsyncpa [#allocation7], 1 }
 0x169   :  { %452 = vsyncpa [#allocation15], 1 }

</bundles_post_ra>
